<compile_context>
chip_gen: v7x
topology: tpu7x:2x2x1
jax: 0.10.0
libtpu: 0.0.40
codegen_flags: <defaults>
</compile_context>

<pallas_src>
import jax
import jax.numpy as jnp
from jax.experimental import pallas as pl
from jax.experimental.pallas import tpu as pltpu


def _round_up(x: int, m: int) -> int:
    return (x + m - 1) // m * m


def _ceil_div(a: int, b: int) -> int:
    return -(-a // b)


def _fwd_dyn_kernel(s_ref, a_ref, w1s_ref, w1a_ref, b1_ref, w2_ref, b2_ref, out_ref):
    # layer 1 as a split-K matmul over [state | action] — no concat anywhere.
    h = jnp.dot(s_ref[...], w1s_ref[...], preferred_element_type=jnp.float32)
    h = h + jnp.dot(a_ref[...], w1a_ref[...], preferred_element_type=jnp.float32)
    h = h + b1_ref[...]                              # bias kept in f32
    # LeakyReLU (PyTorch default negative_slope=0.01), in f32 (v5e VPU has no bf16).
    h = jnp.where(h >= 0, h, 0.01 * h)
    # layer 2: cast activations to the streamed compute dtype for the MXU, accumulate f32.
    out = jnp.dot(h.astype(w2_ref.dtype), w2_ref[...], preferred_element_type=jnp.float32)
    out_ref[...] = (out + b2_ref[...]).astype(out_ref.dtype)


def forward_dynamics(state, action, w1, b1, w2, b2, *,
                     batch_tile=None, compute_dtype=jnp.bfloat16,
                     out_dtype=jnp.float32):
    """state:(B,S), action:(B,A), w1:(S+A,H), b1:(1,H), w2:(H,S), b2:(1,S) -> (B,S)."""
    B, state_dim = state.shape
    action_dim = action.shape[1]
    hid_dim = w1.shape[1]
    out_dim = w2.shape[1]
    cbytes = jnp.dtype(compute_dtype).itemsize
    obytes = jnp.dtype(out_dtype).itemsize

    # ---- TPU-generation-aware knobs --------------------------------------
    kind = jax.devices()[0].device_kind.lower()
    is_v7 = "7" in kind                               # v7x: 64 MiB VMEM, 2 TC/chip
    vmem_limit = (48 if is_v7 else 100) * 1024 * 1024
    if batch_tile is None:
        batch_tile = 2048 if is_v7 else 1024

    # ---- lane-dense padding of the output-side feature dims only ---------
    hid_pad = _round_up(hid_dim, 128)
    out_pad = _round_up(out_dim, 128)

    # ---- batch tiling: balanced last tile, sublane-aligned for the dtype --
    sub = max(8, 32 // cbytes)                        # 8 (f32) / 16 (bf16) sublanes
    n_tiles = max(1, _ceil_div(B, batch_tile))
    TB = _round_up(_ceil_div(B, n_tiles), sub)
    if is_v7:                                         # >=2 grid steps so both TCs work
        while _ceil_div(B, TB) < 2 and TB > sub:
            TB = max(sub, _round_up(TB // 2, sub))
    # keep resident weights (worst-case double-buffered) + streamed tiles in VMEM
    w_resident = (2 * cbytes * ((state_dim + action_dim) * hid_pad + hid_pad * out_pad)
                  + 2 * 4 * (hid_pad + out_pad))
    def _tile_bytes(tb):
        return 2 * tb * ((state_dim + action_dim) * cbytes + out_pad * obytes)
    while w_resident + _tile_bytes(TB) > 0.8 * vmem_limit and TB > sub:
        TB = max(sub, _round_up(TB // 2, sub))

    B_pad = _round_up(B, TB)
    grid = (B_pad // TB,)

    # ---- activations: cast (fuses with the producer under jit); pad only the tail tile
    s = state.astype(compute_dtype)
    a = action.astype(compute_dtype)
    if B_pad != B:
        s = jnp.pad(s, ((0, B_pad - B), (0, 0)))
        a = jnp.pad(a, ((0, B_pad - B), (0, 0)))

    # ---- weights/biases: exact zero padding (zero K rows / zero N cols); one-time in practice
    w1c = w1.astype(compute_dtype)
    w1s = jnp.pad(w1c[:state_dim], ((0, 0), (0, hid_pad - hid_dim)))
    w1a = jnp.pad(w1c[state_dim:], ((0, 0), (0, hid_pad - hid_dim)))
    b1p = jnp.pad(jnp.reshape(b1, (1, -1)).astype(jnp.float32),
                  ((0, 0), (0, hid_pad - hid_dim)))
    w2p = jnp.pad(w2.astype(compute_dtype),
                  ((0, hid_pad - hid_dim), (0, out_pad - out_dim)))
    b2p = jnp.pad(jnp.reshape(b2, (1, -1)).astype(jnp.float32),
                  ((0, 0), (0, out_pad - out_dim)))

    # ---- scheduling hints --------------------------------------------------
    if is_v7 and grid[0] >= 2:
        dim_sem = (getattr(pltpu, "CORE_PARALLEL", "parallel"),)
    else:
        dim_sem = ("parallel",)

    flops = 2 * B_pad * ((state_dim + action_dim) * hid_pad + hid_pad * out_pad)
    bytes_accessed = (B_pad * (state_dim + action_dim) * cbytes       # streamed input
                      + B_pad * out_pad * obytes                      # streamed output
                      + ((state_dim + action_dim) * hid_pad
                         + hid_pad * out_pad) * cbytes                # resident weights
                      + (hid_pad + out_pad) * 4)                      # biases

    buffered_cls = getattr(pl, "Buffered", None)

    def _resident_spec(shape, single):
        index_map = lambda i: (0,) * len(shape)       # constant block -> stays in VMEM
        if single and buffered_cls is not None:
            return pl.BlockSpec(shape, index_map, pipeline_mode=buffered_cls(1))
        return pl.BlockSpec(shape, index_map)

    def _run(single_buffered_weights):
        in_specs = [
            pl.BlockSpec((TB, state_dim), lambda i: (i, 0)),   # stream over batch
            pl.BlockSpec((TB, action_dim), lambda i: (i, 0)),  # stream over batch
            _resident_spec((state_dim, hid_pad), single_buffered_weights),
            _resident_spec((action_dim, hid_pad), single_buffered_weights),
            _resident_spec((1, hid_pad), single_buffered_weights),
            _resident_spec((hid_pad, out_pad), single_buffered_weights),
            _resident_spec((1, out_pad), single_buffered_weights),
        ]
        return pl.pallas_call(
            _fwd_dyn_kernel,
            out_shape=jax.ShapeDtypeStruct((B_pad, out_pad), out_dtype),
            grid=grid,
            in_specs=in_specs,
            out_specs=pl.BlockSpec((TB, out_pad), lambda i: (i, 0)),
            compiler_params=pltpu.CompilerParams(
                dimension_semantics=dim_sem,
                vmem_limit_bytes=vmem_limit),
            cost_estimate=pl.CostEstimate(
                flops=flops, transcendentals=0, bytes_accessed=bytes_accessed),
        )(s, a, w1s, w1a, b1p, w2p, b2p)

    # Single-buffered resident weights; fall back to default double-buffering if
    # this JAX/Mosaic build rejects pipeline_mode (error surfaces at compile time
    # of the eager call and is caught here).
    try:
        out_padded = _run(True)
    except Exception:
        out_padded = _run(False)

    # strip batch + feature padding (callers that can mask may skip this slice)
    return out_padded[:B, :out_dim]


def init_params(key, state_dim, action_dim, hidden_dim):
    """Deterministic init matching nn.Linear + xavier_uniform_ on weights."""
    input_dim = state_dim + action_dim
    k1, k2, k3, k4 = jax.random.split(key, 4)

    def xavier(k, fan_in, fan_out):
        bound = jnp.sqrt(6.0 / (fan_in + fan_out))
        # stored as (in, out) so the kernel does x @ W
        return jax.random.uniform(k, (fan_in, fan_out), jnp.float32, -bound, bound)

    def bias(k, fan_in, fan_out):
        bound = 1.0 / jnp.sqrt(fan_in)
        return jax.random.uniform(k, (1, fan_out), jnp.float32, -bound, bound)

    w1 = xavier(k1, input_dim, hidden_dim)
    b1 = bias(k2, input_dim, hidden_dim)
    w2 = xavier(k3, hidden_dim, state_dim)
    b2 = bias(k4, hidden_dim, state_dim)
    return w1, b1, w2, b2


if __name__ == "__main__":
    state_dim, action_dim, hidden_dim = 16, 8, 32
    batch = 4

    key = jax.random.PRNGKey(0)
    kp, ks, ka = jax.random.split(key, 3)

    w1, b1, w2, b2 = init_params(kp, state_dim, action_dim, hidden_dim)
    state = jax.random.normal(ks, (batch, state_dim), jnp.float32)
    action = jax.random.normal(ka, (batch, action_dim), jnp.float32)

    out = forward_dynamics(state, action, w1, b1, w2, b2)
    jax.block_until_ready(out)
    assert out.shape == (batch, state_dim)
    assert out.dtype == jnp.float32

    # Reference 1: same bf16 quantization / split-W1 math as the kernel (tight).
    cd = jnp.bfloat16
    sq, aq = state.astype(cd), action.astype(cd)
    w1q, w2q = w1.astype(cd), w2.astype(cd)
    hq = (jnp.dot(sq, w1q[:state_dim], preferred_element_type=jnp.float32)
          + jnp.dot(aq, w1q[state_dim:], preferred_element_type=jnp.float32) + b1)
    hq = jnp.where(hq >= 0, hq, 0.01 * hq)
    ref_q = jnp.dot(hq.astype(cd), w2q, preferred_element_type=jnp.float32) + b2
    assert jnp.allclose(out, ref_q, atol=1e-2, rtol=1e-3), float(jnp.max(jnp.abs(out - ref_q)))

    # Reference 2: full-f32 math of the PyTorch module (loose — documents the
    # bf16-storage tolerance; accumulation is f32 in the kernel).
    x = jnp.concatenate([state, action], axis=-1)
    hf = x @ w1 + b1
    hf = jnp.where(hf >= 0, hf, 0.01 * hf)
    ref_f32 = hf @ w2 + b2
    assert jnp.allclose(out, ref_f32, atol=5e-2, rtol=5e-2), float(jnp.max(jnp.abs(out - ref_f32)))

    print("KERNEL_OK")
</pallas_src>

<mosaic_0001>
module attributes {stable_mosaic.version = 11 : i64} {
  func.func @_fwd_dyn_kernel(%arg0: i32, %arg1: memref<16x16xbf16, #tpu.memory_space<vmem>>, %arg2: memref<16x8xbf16, #tpu.memory_space<vmem>>, %arg3: memref<16x128xbf16, #tpu.memory_space<vmem>>, %arg4: memref<8x128xbf16, #tpu.memory_space<vmem>>, %arg5: memref<1x128xf32, #tpu.memory_space<vmem>>, %arg6: memref<128x128xbf16, #tpu.memory_space<vmem>>, %arg7: memref<1x128xf32, #tpu.memory_space<vmem>>, %arg8: memref<16x128xf32, #tpu.memory_space<vmem>>) attributes {dimension_semantics = [#tpu.dimension_semantics<parallel>], iteration_bounds = array<i64: 1>, scalar_prefetch = 0 : i64, scratch_operands = 0 : i64, tpu.core_type = #tpu.core_type<tc>, window_params = [{transform_indices = @transform_0, window_bounds = array<i64: 16, 16>}, {transform_indices = @transform_1, window_bounds = array<i64: 16, 8>}, {pipeline_mode = #tpu.pipeline_mode<synchronous>, transform_indices = @transform_2, window_bounds = array<i64: 16, 128>}, {pipeline_mode = #tpu.pipeline_mode<synchronous>, transform_indices = @transform_3, window_bounds = array<i64: 8, 128>}, {pipeline_mode = #tpu.pipeline_mode<synchronous>, transform_indices = @transform_4, window_bounds = array<i64: 1, 128>}, {pipeline_mode = #tpu.pipeline_mode<synchronous>, transform_indices = @transform_5, window_bounds = array<i64: 128, 128>}, {pipeline_mode = #tpu.pipeline_mode<synchronous>, transform_indices = @transform_6, window_bounds = array<i64: 1, 128>}, {transform_indices = @transform_7, window_bounds = array<i64: 16, 128>}]} {
    %c0 = arith.constant 0 : index
    %c0_0 = arith.constant 0 : index
    %0 = vector.load %arg1[%c0, %c0_0] : memref<16x16xbf16, #tpu.memory_space<vmem>>, vector<16x16xbf16>
    %c0_1 = arith.constant 0 : index
    %c0_2 = arith.constant 0 : index
    %1 = vector.load %arg3[%c0_1, %c0_2] : memref<16x128xbf16, #tpu.memory_space<vmem>>, vector<16x128xbf16>
    %cst = arith.constant dense<0.000000e+00> : vector<16x128xf32>
    %2 = tpu.matmul %0, %1, %cst {dimension_numbers = #tpu.dot_dimension_numbers<[1], [0], [0], [1], [0, 0, 1, 1], [], []>} : vector<16x16xbf16>, vector<16x128xbf16>, vector<16x128xf32> -> vector<16x128xf32>
    %c0_3 = arith.constant 0 : index
    %c0_4 = arith.constant 0 : index
    %3 = vector.load %arg2[%c0_3, %c0_4] : memref<16x8xbf16, #tpu.memory_space<vmem>>, vector<16x8xbf16>
    %c0_5 = arith.constant 0 : index
    %c0_6 = arith.constant 0 : index
    %4 = vector.load %arg4[%c0_5, %c0_6] : memref<8x128xbf16, #tpu.memory_space<vmem>>, vector<8x128xbf16>
    %cst_7 = arith.constant dense<0.000000e+00> : vector<16x128xf32>
    %5 = tpu.matmul %3, %4, %cst_7 {dimension_numbers = #tpu.dot_dimension_numbers<[1], [0], [0], [1], [0, 0, 1, 1], [], []>} : vector<16x8xbf16>, vector<8x128xbf16>, vector<16x128xf32> -> vector<16x128xf32>
    %6 = arith.addf %2, %5 : vector<16x128xf32>
    %c0_8 = arith.constant 0 : index
    %c0_9 = arith.constant 0 : index
    %7 = vector.load %arg5[%c0_8, %c0_9] : memref<1x128xf32, #tpu.memory_space<vmem>>, vector<1x128xf32>
    %8 = vector.broadcast %7 : vector<1x128xf32> to vector<16x128xf32>
    %9 = arith.addf %6, %8 : vector<16x128xf32>
    %cst_10 = arith.constant 0.000000e+00 : f32
    %10 = vector.broadcast %cst_10 : f32 to vector<16x128xf32>
    %11 = arith.cmpf oge, %9, %10 : vector<16x128xf32>
    %cst_11 = arith.constant 0.00999999977 : f32
    %12 = vector.broadcast %cst_11 : f32 to vector<16x128xf32>
    %13 = arith.mulf %12, %9 : vector<16x128xf32>
    %14 = arith.select %11, %9, %13 : vector<16x128xi1>, vector<16x128xf32>
    %15 = arith.truncf %14 : vector<16x128xf32> to vector<16x128xbf16>
    %c0_12 = arith.constant 0 : index
    %c0_13 = arith.constant 0 : index
    %16 = vector.load %arg6[%c0_12, %c0_13] : memref<128x128xbf16, #tpu.memory_space<vmem>>, vector<128x128xbf16>
    %cst_14 = arith.constant dense<0.000000e+00> : vector<16x128xf32>
    %17 = tpu.matmul %15, %16, %cst_14 {dimension_numbers = #tpu.dot_dimension_numbers<[1], [0], [0], [1], [0, 0, 1, 1], [], []>} : vector<16x128xbf16>, vector<128x128xbf16>, vector<16x128xf32> -> vector<16x128xf32>
    %c0_15 = arith.constant 0 : index
    %c0_16 = arith.constant 0 : index
    %18 = vector.load %arg7[%c0_15, %c0_16] : memref<1x128xf32, #tpu.memory_space<vmem>>, vector<1x128xf32>
    %19 = vector.broadcast %18 : vector<1x128xf32> to vector<16x128xf32>
    %20 = arith.addf %17, %19 : vector<16x128xf32>
    %c0_17 = arith.constant 0 : index
    %c0_18 = arith.constant 0 : index
    %21 = vector.load %arg8[%c0_17, %c0_18] : memref<16x128xf32, #tpu.memory_space<vmem>>, vector<16x128xf32>
    tpu.vector_store %arg8[%c0_17, %c0_18], %20 {strides = array<i32>} : memref<16x128xf32, #tpu.memory_space<vmem>>, vector<16x128xf32>,
    return
  }
  func.func @transform_0(%arg0: i32) -> (i32, i32) {
    %c0_i32 = arith.constant 0 : i32
    %c0_i32_0 = arith.constant 0 : i32
    return %arg0, %c0_i32 : i32, i32
  }
  func.func @transform_1(%arg0: i32) -> (i32, i32) {
    %c0_i32 = arith.constant 0 : i32
    %c0_i32_0 = arith.constant 0 : i32
    return %arg0, %c0_i32 : i32, i32
  }
  func.func @transform_2(%arg0: i32) -> (i32, i32) {
    %c0_i32 = arith.constant 0 : i32
    %c0_i32_0 = arith.constant 0 : i32
    %c0_i32_1 = arith.constant 0 : i32
    return %c0_i32, %c0_i32_0 : i32, i32
  }
  func.func @transform_3(%arg0: i32) -> (i32, i32) {
    %c0_i32 = arith.constant 0 : i32
    %c0_i32_0 = arith.constant 0 : i32
    %c0_i32_1 = arith.constant 0 : i32
    return %c0_i32, %c0_i32_0 : i32, i32
  }
  func.func @transform_4(%arg0: i32) -> (i32, i32) {
    %c0_i32 = arith.constant 0 : i32
    %c0_i32_0 = arith.constant 0 : i32
    %c0_i32_1 = arith.constant 0 : i32
    return %c0_i32, %c0_i32_0 : i32, i32
  }
  func.func @transform_5(%arg0: i32) -> (i32, i32) {
    %c0_i32 = arith.constant 0 : i32
    %c0_i32_0 = arith.constant 0 : i32
    %c0_i32_1 = arith.constant 0 : i32
    return %c0_i32, %c0_i32_0 : i32, i32
  }
  func.func @transform_6(%arg0: i32) -> (i32, i32) {
    %c0_i32 = arith.constant 0 : i32
    %c0_i32_0 = arith.constant 0 : i32
    %c0_i32_1 = arith.constant 0 : i32
    return %c0_i32, %c0_i32_0 : i32, i32
  }
  func.func @transform_7(%arg0: i32) -> (i32, i32) {
    %c0_i32 = arith.constant 0 : i32
    %c0_i32_0 = arith.constant 0 : i32
    return %arg0, %c0_i32 : i32, i32
  }
}

module attributes {stable_mosaic.version = 11 : i64} {
  func.func @_fwd_dyn_kernel(%arg0: i32, %arg1: memref<16x16xbf16, #tpu.memory_space<vmem>>, %arg2: memref<16x8xbf16, #tpu.memory_space<vmem>>, %arg3: memref<16x128xbf16, #tpu.memory_space<vmem>>, %arg4: memref<8x128xbf16, #tpu.memory_space<vmem>>, %arg5: memref<1x128xf32, #tpu.memory_space<vmem>>, %arg6: memref<128x128xbf16, #tpu.memory_space<vmem>>, %arg7: memref<1x128xf32, #tpu.memory_space<vmem>>, %arg8: memref<16x128xf32, #tpu.memory_space<vmem>>) attributes {dimension_semantics = [#tpu.dimension_semantics<parallel>], iteration_bounds = array<i64: 1>, scalar_prefetch = 0 : i64, scratch_operands = 0 : i64, tpu.core_type = #tpu.core_type<tc>, window_params = [{transform_indices = @transform_0, window_bounds = array<i64: 16, 16>}, {transform_indices = @transform_1, window_bounds = array<i64: 16, 8>}, {pipeline_mode = #tpu.pipeline_mode<synchronous>, transform_indices = @transform_2, window_bounds = array<i64: 16, 128>}, {pipeline_mode = #tpu.pipeline_mode<synchronous>, transform_indices = @transform_3, window_bounds = array<i64: 8, 128>}, {pipeline_mode = #tpu.pipeline_mode<synchronous>, transform_indices = @transform_4, window_bounds = array<i64: 1, 128>}, {pipeline_mode = #tpu.pipeline_mode<synchronous>, transform_indices = @transform_5, window_bounds = array<i64: 128, 128>}, {pipeline_mode = #tpu.pipeline_mode<synchronous>, transform_indices = @transform_6, window_bounds = array<i64: 1, 128>}, {transform_indices = @transform_7, window_bounds = array<i64: 16, 128>}]} {
    %c0 = arith.constant 0 : index
    %c0_0 = arith.constant 0 : index
    %0 = vector.load %arg1[%c0, %c0_0] : memref<16x16xbf16, #tpu.memory_space<vmem>>, vector<16x16xbf16>
    %c0_1 = arith.constant 0 : index
    %c0_2 = arith.constant 0 : index
    %1 = vector.load %arg3[%c0_1, %c0_2] : memref<16x128xbf16, #tpu.memory_space<vmem>>, vector<16x128xbf16>
    %cst = arith.constant dense<0.000000e+00> : vector<16x128xf32>
    %2 = tpu.matmul %0, %1, %cst {dimension_numbers = #tpu.dot_dimension_numbers<[1], [0], [0], [1], [0, 0, 1, 1], [], []>} : vector<16x16xbf16>, vector<16x128xbf16>, vector<16x128xf32> -> vector<16x128xf32>
    %c0_3 = arith.constant 0 : index
    %c0_4 = arith.constant 0 : index
    %3 = vector.load %arg2[%c0_3, %c0_4] : memref<16x8xbf16, #tpu.memory_space<vmem>>, vector<16x8xbf16>
    %c0_5 = arith.constant 0 : index
    %c0_6 = arith.constant 0 : index
    %4 = vector.load %arg4[%c0_5, %c0_6] : memref<8x128xbf16, #tpu.memory_space<vmem>>, vector<8x128xbf16>
    %cst_7 = arith.constant dense<0.000000e+00> : vector<16x128xf32>
    %5 = tpu.matmul %3, %4, %cst_7 {dimension_numbers = #tpu.dot_dimension_numbers<[1], [0], [0], [1], [0, 0, 1, 1], [], []>} : vector<16x8xbf16>, vector<8x128xbf16>, vector<16x128xf32> -> vector<16x128xf32>
    %6 = arith.addf %2, %5 : vector<16x128xf32>
    %c0_8 = arith.constant 0 : index
    %c0_9 = arith.constant 0 : index
    %7 = vector.load %arg5[%c0_8, %c0_9] : memref<1x128xf32, #tpu.memory_space<vmem>>, vector<1x128xf32>
    %8 = vector.broadcast %7 : vector<1x128xf32> to vector<16x128xf32>
    %9 = arith.addf %6, %8 : vector<16x128xf32>
    %cst_10 = arith.constant 0.000000e+00 : f32
    %10 = vector.broadcast %cst_10 : f32 to vector<16x128xf32>
    %11 = arith.cmpf oge, %9, %10 : vector<16x128xf32>
    %cst_11 = arith.constant 0.00999999977 : f32
    %12 = vector.broadcast %cst_11 : f32 to vector<16x128xf32>
    %13 = arith.mulf %12, %9 : vector<16x128xf32>
    %14 = arith.select %11, %9, %13 : vector<16x128xi1>, vector<16x128xf32>
    %15 = arith.truncf %14 : vector<16x128xf32> to vector<16x128xbf16>
    %c0_12 = arith.constant 0 : index
    %c0_13 = arith.constant 0 : index
    %16 = vector.load %arg6[%c0_12, %c0_13] : memref<128x128xbf16, #tpu.memory_space<vmem>>, vector<128x128xbf16>
    %cst_14 = arith.constant dense<0.000000e+00> : vector<16x128xf32>
    %17 = tpu.matmul %15, %16, %cst_14 {dimension_numbers = #tpu.dot_dimension_numbers<[1], [0], [0], [1], [0, 0, 1, 1], [], []>} : vector<16x128xbf16>, vector<128x128xbf16>, vector<16x128xf32> -> vector<16x128xf32>
    %c0_15 = arith.constant 0 : index
    %c0_16 = arith.constant 0 : index
    %18 = vector.load %arg7[%c0_15, %c0_16] : memref<1x128xf32, #tpu.memory_space<vmem>>, vector<1x128xf32>
    %19 = vector.broadcast %18 : vector<1x128xf32> to vector<16x128xf32>
    %20 = arith.addf %17, %19 : vector<16x128xf32>
    %c0_17 = arith.constant 0 : index
    %c0_18 = arith.constant 0 : index
    %21 = vector.load %arg8[%c0_17, %c0_18] : memref<16x128xf32, #tpu.memory_space<vmem>>, vector<16x128xf32>
    tpu.vector_store %arg8[%c0_17, %c0_18], %20 {strides = array<i32>} : memref<16x128xf32, #tpu.memory_space<vmem>>, vector<16x128xf32>,
    return
  }
  func.func @transform_0(%arg0: i32) -> (i32, i32) {
    %c0_i32 = arith.constant 0 : i32
    %c0_i32_0 = arith.constant 0 : i32
    return %arg0, %c0_i32 : i32, i32
  }
  func.func @transform_1(%arg0: i32) -> (i32, i32) {
    %c0_i32 = arith.constant 0 : i32
    %c0_i32_0 = arith.constant 0 : i32
    return %arg0, %c0_i32 : i32, i32
  }
  func.func @transform_2(%arg0: i32) -> (i32, i32) {
    %c0_i32 = arith.constant 0 : i32
    %c0_i32_0 = arith.constant 0 : i32
    %c0_i32_1 = arith.constant 0 : i32
    return %c0_i32, %c0_i32_0 : i32, i32
  }
  func.func @transform_3(%arg0: i32) -> (i32, i32) {
    %c0_i32 = arith.constant 0 : i32
    %c0_i32_0 = arith.constant 0 : i32
    %c0_i32_1 = arith.constant 0 : i32
    return %c0_i32, %c0_i32_0 : i32, i32
  }
  func.func @transform_4(%arg0: i32) -> (i32, i32) {
    %c0_i32 = arith.constant 0 : i32
    %c0_i32_0 = arith.constant 0 : i32
    %c0_i32_1 = arith.constant 0 : i32
    return %c0_i32, %c0_i32_0 : i32, i32
  }
  func.func @transform_5(%arg0: i32) -> (i32, i32) {
    %c0_i32 = arith.constant 0 : i32
    %c0_i32_0 = arith.constant 0 : i32
    %c0_i32_1 = arith.constant 0 : i32
    return %c0_i32, %c0_i32_0 : i32, i32
  }
  func.func @transform_6(%arg0: i32) -> (i32, i32) {
    %c0_i32 = arith.constant 0 : i32
    %c0_i32_0 = arith.constant 0 : i32
    %c0_i32_1 = arith.constant 0 : i32
    return %c0_i32, %c0_i32_0 : i32, i32
  }
  func.func @transform_7(%arg0: i32) -> (i32, i32) {
    %c0_i32 = arith.constant 0 : i32
    %c0_i32_0 = arith.constant 0 : i32
    return %arg0, %c0_i32 : i32, i32
  }
}

</mosaic_0001>

<bundles_post_ra>
// kernel: tpu_custom_call.1
= control target key start
LH: loop header
LB: loop body
LE: loop exit
PB: predicated region body
PF: predicated region fallthrough
CT: control target
= control target key end

     0   :  { %12 = vsyncpa [#allocation3], 0  ;;  %s824_s0 = inlined_call_operand.hbm [shape: bf16[16,16], index: 0, kind: input, shape index: {}]   ;;  %s825_s1 = inlined_call_operand.hbm [shape: bf16[16,8], index: 1, kind: input, shape index: {}]   ;;  %s826_s2 = inlined_call_operand.hbm [shape: bf16[16,128], index: 2, kind: input, shape index: {}]   ;;  %s827_s3 = inlined_call_operand.hbm [shape: bf16[8,128], index: 3, kind: input, shape index: {}]   ;;  %s828_s4 = inlined_call_operand.hbm [shape: f32[1,128], index: 4, kind: input, shape index: {}]   ;;  %s829_s5 = inlined_call_operand.hbm [shape: bf16[128,128], index: 5, kind: input, shape index: {}]   ;;  %s830_s6 = inlined_call_operand.hbm [shape: f32[1,128], index: 6, kind: input, shape index: {}]   ;;  %s831_s7 = inlined_call_operand.hbm [shape: f32[16,128], index: 7, kind: output, shape index: {}]  }
   0x1   :  { %13 = vsyncpa [#allocation6], 0 }
   0x2   :  { %14 = vsyncpa [#allocation9], 0 }
   0x3   :  { %15 = vsyncpa [#allocation12], 0 }
   0x4   :  { %16 = vsyncpa [#allocation4], 0  ;;  %s655_s24 = smov [#allocation5]   ;;  %s656_s26 = smov [#allocation8]  }
   0x5   :  { %s34_s25 = sshll.u32 %s655_s24, 4  ;;  %s59_s27 = sshll.u32 %s656_s26, 4  ;;  %s35_s25 = int_to_ptr.vmem [resolvable:$true] %s34_s25  ;;  %s60_s27 = int_to_ptr.vmem [resolvable:$true] %s59_s27 }
   0x6   :  { %s469_s30 = scalar_lea.hbm %s825_s1, 128 }
   0x7   :  { %p470_p0 = scmp.ne.s32.totalorder %s825_s1, %s469_s30  ;;  %p473_p1 = scmp.lt.u32.totalorder %s469_s30, %s825_s1 }
   0x9   :  { %p475_p2 = pnand %p473_p1, %p470_p0 }
   0xb   :  { %478 = shalt.err (!%p475_p2)
}
   0xc   :  { %s479_s12 = scalar_lea.vmem %s35_s25, 128  ;;  %p484_p4 = scmp.lt.s32.totalorder %s35_s25, %s35_s25 }
   0xd   :  { %p480_p3 = scmp.ne.s32.totalorder %s35_s25, %s479_s12  ;;  %p485_p5 = scmp.lt.s32.totalorder %s479_s12, %s479_s12 }
   0xf   :  { %p486_p6 = por %p485_p5, %p484_p4 }
  0x11   :  { %p487_p7 = pnand %p486_p6, %p480_p3 }
  0x13   :  { %490 = shalt.err (!%p487_p7)
}
  0x14   :  { %s657_s13 = smov 64   ;;  %s658_s14 = smov 4  }
  0x15   :  { %40 = dma.hbm_to_vmem [thread:$0]  %s825_s1, 128, %s35_s25, [#allocation6], %s657_s13, %s657_s13, %s658_s14  }
  0x16   :  { %s491_s19 = scalar_lea.hbm %s827_s3, 64 }
  0x17   :  { %p492_p8 = scmp.ne.s32.totalorder %s827_s3, %s491_s19  ;;  %p495_p9 = scmp.lt.u32.totalorder %s491_s19, %s827_s3 }
  0x19   :  { %p497_p10 = pnand %p495_p9, %p492_p8 }
  0x1b   :  { %500 = shalt.err (!%p497_p10)
}
  0x1c   :  { %s501_s24 = scalar_lea.vmem %s60_s27, 64  ;;  %p506_p12 = scmp.lt.s32.totalorder %s60_s27, %s60_s27 }
  0x1d   :  { %p502_p11 = scmp.ne.s32.totalorder %s60_s27, %s501_s24  ;;  %p507_p13 = scmp.lt.s32.totalorder %s501_s24, %s501_s24 }
  0x1f   :  { %p508_p0 = por %p507_p13, %p506_p12 }
  0x21   :  { %p509_p1 = pnand %p508_p0, %p502_p11 }
  0x23   :  { %512 = shalt.err (!%p509_p1)
}
  0x24   :  { %62 = dma.hbm_to_vmem [thread:$0]  %s827_s3, 64, %s60_s27, [#allocation9]  }
  0x25   :  { %s659_s26 = smov [#allocation11]   ;;  %s660_s29 = smov [#allocation2]  }
  0x26   :  { %s78_s28 = sshll.u32 %s659_s26, 4  ;;  %s22_s30 = sshll.u32 %s660_s29, 4  ;;  %s79_s28 = int_to_ptr.vmem [resolvable:$true] %s78_s28  ;;  %s736_s30 = int_to_ptr.vmem [resolvable:$true] %s22_s30 }
  0x27   :  { %s513_s10 = scalar_lea.hbm %s829_s5, 1024 }
  0x28   :  { %p514_p2 = scmp.ne.s32.totalorder %s829_s5, %s513_s10  ;;  %p517_p3 = scmp.lt.u32.totalorder %s513_s10, %s829_s5 }
  0x2a   :  { %p519_p4 = pnand %p517_p3, %p514_p2 }
  0x2c   :  { %522 = shalt.err (!%p519_p4)
}
  0x2d   :  { %s523_s3 = scalar_lea.vmem %s79_s28, 1024  ;;  %p528_p6 = scmp.lt.s32.totalorder %s79_s28, %s79_s28 }
  0x2e   :  { %p524_p5 = scmp.ne.s32.totalorder %s79_s28, %s523_s3  ;;  %p529_p7 = scmp.lt.s32.totalorder %s523_s3, %s523_s3 }
  0x30   :  { %p530_p8 = por %p529_p7, %p528_p6 }
  0x32   :  { %p531_p9 = pnand %p530_p8, %p524_p5 }
  0x34   :  { %534 = shalt.err (!%p531_p9)
}
  0x35   :  { %84 = dma.hbm_to_vmem [thread:$0]  %s829_s5, 1024, %s79_s28, [#allocation12], %s657_s13, %s657_s13, %s658_s14  }
  0x36   :  { %s535_s20 = scalar_lea.hbm %s824_s0, 128 }
  0x37   :  { %p536_p10 = scmp.ne.s32.totalorder %s824_s0, %s535_s20  ;;  %p539_p11 = scmp.lt.u32.totalorder %s535_s20, %s824_s0 }
  0x39   :  { %p541_p12 = pnand %p539_p11, %p536_p10 }
  0x3b   :  { %544 = shalt.err (!%p541_p12)
}
  0x3c   :  { %s545_s1 = scalar_lea.vmem %s736_s30, 128  ;;  %p550_p0 = scmp.lt.s32.totalorder %s736_s30, %s736_s30 }
  0x3d   :  { %p546_p13 = scmp.ne.s32.totalorder %s736_s30, %s545_s1  ;;  %p551_p1 = scmp.lt.s32.totalorder %s545_s1, %s545_s1 }
  0x3f   :  { %p552_p2 = por %p551_p1, %p550_p0 }
  0x41   :  { %p553_p3 = pnand %p552_p2, %p546_p13 }
  0x43   :  { %556 = shalt.err (!%p553_p3)
}
  0x44   :  { %28 = dma.hbm_to_vmem [thread:$0]  %s824_s0, 128, %s736_s30, [#allocation3], %s657_s13, %s657_s13, %s658_s14  }
  0x45   :  { %s661_s26 = smov [#allocation7]   ;;  %s662_s29 = smov [#allocation10]  }
  0x46   :  { %s46_s28 = sshll.u32 %s661_s26, 4  ;;  %s69_s8 = sshll.u32 %s662_s29, 4  ;;  %s47_s28 = int_to_ptr.vmem [resolvable:$true] %s46_s28  ;;  %s70_s8 = int_to_ptr.vmem [resolvable:$true] %s69_s8 }
  0x47   :  { %s557_s11 = scalar_lea.hbm %s826_s2, 128 }
  0x48   :  { %p558_p4 = scmp.ne.s32.totalorder %s826_s2, %s557_s11  ;;  %p561_p5 = scmp.lt.u32.totalorder %s557_s11, %s826_s2 }
  0x4a   :  { %p563_p6 = pnand %p561_p5, %p558_p4 }
  0x4c   :  { %566 = shalt.err (!%p563_p6)
}
  0x4d   :  { %s567_s0 = scalar_lea.vmem %s47_s28, 128  ;;  %p572_p8 = scmp.lt.s32.totalorder %s47_s28, %s47_s28 }
  0x4e   :  { %p568_p7 = scmp.ne.s32.totalorder %s47_s28, %s567_s0  ;;  %p573_p9 = scmp.lt.s32.totalorder %s567_s0, %s567_s0 }
  0x50   :  { %p574_p10 = por %p573_p9, %p572_p8 }
  0x52   :  { %p575_p11 = pnand %p574_p10, %p568_p7 }
  0x54   :  { %578 = shalt.err (!%p575_p11)
}
  0x55   :  { %52 = dma.hbm_to_vmem [thread:$0]  %s826_s2, 128, %s47_s28, [#allocation6], %s657_s13, %s657_s13, %s658_s14  }
  0x56   :  { %s579_s19 = scalar_lea.hbm %s828_s4, 16 }
  0x57   :  { %p580_p12 = scmp.ne.s32.totalorder %s828_s4, %s579_s19  ;;  %p583_p13 = scmp.lt.u32.totalorder %s579_s19, %s828_s4 }
  0x59   :  { %p585_p0 = pnand %p583_p13, %p580_p12 }
  0x5b   :  { %588 = shalt.err (!%p585_p0)
}
  0x5c   :  { %s589_s24 = scalar_lea.vmem %s70_s8, 16  ;;  %s593_s1 = scalar_lea.vmem %s70_s8, 32 }
  0x5d   :  { %p590_p1 = scmp.ne.s32.totalorder %s70_s8, %s589_s24  ;;  %p594_p2 = scmp.lt.s32.totalorder %s70_s8, %s70_s8 }
  0x5e   :  { %p595_p3 = scmp.lt.s32.totalorder %s593_s1, %s589_s24 }
  0x60   :  { %p596_p4 = por %p595_p3, %p594_p2 }
  0x62   :  { %p597_p5 = pnand %p596_p4, %p590_p1 }
  0x64   :  { %600 = shalt.err (!%p597_p5)
}
  0x65   :  { %72 = dma.hbm_to_vmem [thread:$0]  %s828_s4, 16, %s70_s8, [#allocation9]  }
  0x66   :  { %s663_s14 = smov [#allocation13]   ;;  %s601_s28 = scalar_lea.hbm %s830_s6, 16 }
  0x67   :  { %s91_s5 = sshll.u32 %s663_s14, 4  ;;  %p602_p6 = scmp.ne.s32.totalorder %s830_s6, %s601_s28  ;;  %s92_s5 = int_to_ptr.vmem [resolvable:$true] %s91_s5 }
  0x68   :  { %p605_p7 = scmp.lt.u32.totalorder %s601_s28, %s830_s6 }
  0x6a   :  { %p607_p8 = pnand %p605_p7, %p602_p6 }
  0x6c   :  { %610 = shalt.err (!%p607_p8)
}
  0x6d   :  { %s611_s12 = scalar_lea.vmem %s92_s5, 16  ;;  %s615_s4 = scalar_lea.vmem %s92_s5, 32 }
  0x6e   :  { %p612_p9 = scmp.ne.s32.totalorder %s92_s5, %s611_s12  ;;  %p616_p10 = scmp.lt.s32.totalorder %s92_s5, %s92_s5 }
  0x6f   :  { %p617_p11 = scmp.lt.s32.totalorder %s615_s4, %s611_s12 }
  0x71   :  { %p618_p12 = por %p617_p11, %p616_p10 }
  0x73   :  { %p619_p13 = pnand %p618_p12, %p612_p9 }
  0x75   :  { %622 = shalt.err (!%p619_p13)
}
  0x76   :  { %94 = dma.hbm_to_vmem [thread:$0]  %s830_s6, 16, %s92_s5, [#allocation12]  }
  0x77   :  { %645 = dma.done.wait [#allocation3], 128  }
  0x78   :  { %646 = vsyncadd [#allocation3], 4294967168 }
  0x79   :  { %647 = dma.done.wait [#allocation6], 256  }
  0x7a   :  { %648 = vsyncadd [#allocation6], 4294967040 }
  0x7b   :  { %649 = dma.done.wait [#allocation9], 80  }
  0x7c   :  { %650 = vsyncadd [#allocation9], 4294967216 }
  0x7d   :  { %651 = dma.done.wait [#allocation12], 1040  }
  0x7e   :  { %652 = vsyncadd [#allocation12], 4294966256  ;;  %v664_v0 = vmov 0.0   ;;  %vm665_vm0 = vmmov 0   ;;  %vm133_vm1 = vcmask 1043456   ;;  %v458_v3 = vld [vmem:[#allocation5] sm:$0xff]  }
  0x7f   :  { %412 = vmatprep.subr.bf16.mxu1 %v664_v0  ;;  %414 = vmatprep.mubr.msk.bf16.mxu1 %vm665_vm0, %v664_v0  ;;  %v123_v1 = vld [vmem:[#allocation8] sm:$0xf]  ;;  %vm129_vm2 = vcmask 64512   ;;  %v459_v4 = vld [vmem:[#allocation7] sm:$0xff]   ;;  %v461_v5 = vld [vmem:[#allocation11] sm:$0xff]   ;;  %vm189_vm3 = vcmask 130048  }
  0x80   :  { %424 = vmatprep.subr.bf16.mxu0 %v664_v0  ;;  %440 = vmatprep.mubr.msk.bf16.mxu0 %vm665_vm0, %v664_v0  ;;  %v135_v2 = vsel %vm133_vm1, %v123_v1, 0  ;;  %v462_v6 = vld [vmem:[#allocation11 + $0x8] sm:$0xff]   ;;  %v463_v8 = vld [vmem:[#allocation11 + $0x10] sm:$0xff]   ;;  %v464_v9 = vld [vmem:[#allocation11 + $0x18] sm:$0xff]   ;;  %s666_s6 = smov [#allocation14]  }
  0x81   :  { %413 = vmatpush3.bf16.msra.mxu1 %v135_v2  ;;  %425 = vmatpush3.bf16.msra.mxu0 %v461_v5  ;;  %v460_v7 = vld [vmem:[#allocation2] sm:$0xff]   ;;  %v467_v12 = vld [vmem:[#allocation11 + $0x30] sm:$0xff]   ;;  %v468_v13 = vld [vmem:[#allocation11 + $0x38] sm:$0xff]   ;;  %s369_s16 = sshll.u32 %s666_s6, 4  ;;  %s370_s16 = int_to_ptr.vmem [resolvable:$true] %s369_s16 }
  0x82   :  { %418 = vmatprep.subr.bf16.mxu1 %v664_v0  ;;  %426 = vmatprep.subr.bf16.mxu0 %v664_v0  ;;  %v465_v10 = vld [vmem:[#allocation11 + $0x20] sm:$0xff]   ;;  %v466_v11 = vld [vmem:[#allocation11 + $0x28] sm:$0xff]   ;;  %v389_v19 = vld [vmem:[#allocation10] ss:$0 sm:$0xff]  ;;  %s623_s3 = scalar_lea.vmem %s370_s16, 256  ;;  %p628_p1 = scmp.lt.s32.totalorder %s370_s16, %s370_s16 }
  0x83   :  { %v390_v32 = vld [vmem:[#allocation13] ss:$0 sm:$0xff]  ;;  %p624_p0 = scmp.ne.s32.totalorder %s370_s16, %s623_s3  ;;  %p629_p2 = scmp.lt.s32.totalorder %s623_s3, %s623_s3 }
  0x84   :  { %415 = vmatmul.mubr.msk.bf16.vlgmr.msra.gmra.mrb[0].mxu1 %vm129_vm2, %v458_v3 }
  0x85   :  { %419 = vmatpush3.bf16.msra.mxu1 %v459_v4  ;;  %420 = vmatprep.mubr.msk.bf16.mxu1 %vm665_vm0, %v664_v0  ;;  %p630_p3 = por %p629_p2, %p628_p1 }
  0x86   :  { %427 = vmatpush3.bf16.msra.mxu0 %v462_v6 }
  0x87   :  { %428 = vmatprep.subr.bf16.mxu0 %v664_v0  ;;  %p631_p4 = pnand %p630_p3, %p624_p0 }
  0x8a   :  { %429 = vmatpush3.bf16.msra.mxu0 %v463_v8 }
  0x8b   :  { %430 = vmatprep.subr.bf16.mxu0 %v664_v0 }
  0x8c   :  { %421 = vmatmul.mubr.msk.bf16.vlgmr.msra.gmra.mrb[4].mxu1 %vm189_vm3, %v460_v7 }
  0x8e   :  { %431 = vmatpush3.bf16.msra.mxu0 %v464_v9 }
  0x8f   :  { %432 = vmatprep.subr.bf16.mxu0 %v664_v0 }
  0x92   :  { %433 = vmatpush3.bf16.msra.mxu0 %v465_v10 }
  0x93   :  { %434 = vmatprep.subr.bf16.mxu0 %v664_v0 }
  0x96   :  { %435 = vmatpush3.bf16.msra.mxu0 %v466_v11 }
  0x97   :  { %436 = vmatprep.subr.bf16.mxu0 %v664_v0 }
  0x9a   :  { %437 = vmatpush3.bf16.msra.mxu0 %v467_v12 }
  0x9b   :  { %438 = vmatprep.subr.bf16.mxu0 %v664_v0 }
  0x9e   :  { %439 = vmatpush3.bf16.msra.mxu0 %v468_v13 }
 0x157   :  { %v171_v14 = vpop.f32.mrb[0].mxu1 }
 0x158   :  { %v416_v15 = vpop.f32.mrb[1].mxu1 }
 0x159   :  { %v174_v16 = vpop.f32.mrb[2].mxu1 }
 0x15a   :  { %v417_v17 = vpop.f32.mrb[3].mxu1 }
 0x15f   :  { %v227_v18 = vpop.f32.mrb[4].mxu1 }
 0x160   :  { %v228_v20 = vadd.f32 %v227_v18, %v171_v14  ;;  %v422_v21 = vpop.f32.mrb[5].mxu1 }
 0x161   :  { %v230_v22 = vpop.f32.mrb[6].mxu1 }
 0x162   :  { %v241_v23 = vadd.f32 %v389_v19, %v228_v20  ;;  %v231_v24 = vadd.f32 %v230_v22, %v174_v16  ;;  %v423_v25 = vpop.f32.mrb[7].mxu1 }
 0x164   :  { %v245_v26 = vmul.f32 0.01, %v241_v23  ;;  %v242_v27 = vadd.f32 %v389_v19, %v231_v24  ;;  %vm243_vm4 = vcmp.ge.f32.partialorder %v241_v23, 0.0 }
 0x166   :  { %vm244_vm5 = vcmp.ge.f32.partialorder %v242_v27, 0.0  ;;  %v246_v28 = vmul.f32 0.01, %v242_v27  ;;  %v247_v29 = vsel %vm243_vm4, %v241_v23, %v245_v26 }
 0x168   :  { %v248_v30 = vsel %vm244_vm5, %v242_v27, %v246_v28 }
 0x169   :  { %v249_v31 = vpack.c.bf16 %v248_v30, %v247_v29 }
 0x16b   :  { %441 = vmatmul.mubr.bf16.vlgmr.msra.gmra.mrb[0].mxu0 %v249_v31 }
 0x23e   :  { %v355_v33 = vpop.f32.mrb[0].mxu0 }
 0x23f   :  { %v356_v34 = vadd.f32 %v390_v32, %v355_v33  ;;  %v442_v35 = vpop.f32.mrb[1].mxu0 }
 0x240   :  { %v358_v36 = vpop.f32.mrb[2].mxu0 }
 0x241   :  { %362 = vst [vmem:[#allocation14] sm:$0xff] %v356_v34  ;;  %v359_v37 = vadd.f32 %v390_v32, %v358_v36  ;;  %v443_v38 = vpop.f32.mrb[3].mxu0 }
 0x243   :  { %363 = vst [vmem:[#allocation14 + $0x8] sm:$0xff] %v359_v37 }
 0x244   :  { %634 = shalt.err (!%p631_p4)
}
 0x245   :  { %s635_s27 = scalar_lea.hbm %s831_s7, 256 }
 0x246   :  { %p636_p5 = scmp.ne.s32.totalorder %s831_s7, %s635_s27  ;;  %p639_p6 = scmp.lt.u32.totalorder %s635_s27, %s831_s7 }
 0x248   :  { %p641_p7 = pnand %p639_p6, %p636_p5 }
 0x24a   :  { %644 = shalt.err (!%p641_p7)
}
 0x24b   :  { %s667_s21 = smov 128   ;;  %s668_s22 = smov 8  }
 0x24c   :  { %375 = dma.vmem_to_hbm [thread:$0]  %s370_s16, 256, %s831_s7, [#allocation4], %s667_s21, %s667_s21, %s668_s22  }
 0x24d   :  { %653 = dma.done.wait [#allocation4], 256  }
 0x24e   :  { %654 = vsyncadd [#allocation4], 4294967040 }
 0x24f   :  { %379 = vsyncpa [#allocation3], 1 }
 0x250   :  { %380 = vsyncpa [#allocation6], 1 }
 0x251   :  { %381 = vsyncpa [#allocation9], 1 }
 0x252   :  { %382 = vsyncpa [#allocation12], 1 }
 0x253   :  { %383 = vsyncpa [#allocation4], 1 }

// kernel: tpu_custom_call.1
= control target key start
LH: loop header
LB: loop body
LE: loop exit
PB: predicated region body
PF: predicated region fallthrough
CT: control target
= control target key end

     0   :  { %12 = vsyncpa [#allocation3], 0  ;;  %s824_s0 = inlined_call_operand.hbm [shape: bf16[16,16], index: 0, kind: input, shape index: {}]   ;;  %s825_s1 = inlined_call_operand.hbm [shape: bf16[16,8], index: 1, kind: input, shape index: {}]   ;;  %s826_s2 = inlined_call_operand.hbm [shape: bf16[16,128], index: 2, kind: input, shape index: {}]   ;;  %s827_s3 = inlined_call_operand.hbm [shape: bf16[8,128], index: 3, kind: input, shape index: {}]   ;;  %s828_s4 = inlined_call_operand.hbm [shape: f32[1,128], index: 4, kind: input, shape index: {}]   ;;  %s829_s5 = inlined_call_operand.hbm [shape: bf16[128,128], index: 5, kind: input, shape index: {}]   ;;  %s830_s6 = inlined_call_operand.hbm [shape: f32[1,128], index: 6, kind: input, shape index: {}]   ;;  %s831_s7 = inlined_call_operand.hbm [shape: f32[16,128], index: 7, kind: output, shape index: {}]  }
   0x1   :  { %13 = vsyncpa [#allocation6], 0 }
   0x2   :  { %14 = vsyncpa [#allocation9], 0 }
   0x3   :  { %15 = vsyncpa [#allocation12], 0 }
   0x4   :  { %16 = vsyncpa [#allocation4], 0  ;;  %s655_s24 = smov [#allocation5]   ;;  %s656_s26 = smov [#allocation8]  }
   0x5   :  { %s34_s25 = sshll.u32 %s655_s24, 4  ;;  %s59_s27 = sshll.u32 %s656_s26, 4  ;;  %s35_s25 = int_to_ptr.vmem [resolvable:$true] %s34_s25  ;;  %s60_s27 = int_to_ptr.vmem [resolvable:$true] %s59_s27 }
   0x6   :  { %s469_s30 = scalar_lea.hbm %s825_s1, 128 }
   0x7   :  { %p470_p0 = scmp.ne.s32.totalorder %s825_s1, %s469_s30  ;;  %p473_p1 = scmp.lt.u32.totalorder %s469_s30, %s825_s1 }
   0x9   :  { %p475_p2 = pnand %p473_p1, %p470_p0 }
   0xb   :  { %478 = shalt.err (!%p475_p2)
}
   0xc   :  { %s479_s12 = scalar_lea.vmem %s35_s25, 128  ;;  %p484_p4 = scmp.lt.s32.totalorder %s35_s25, %s35_s25 }
   0xd   :  { %p480_p3 = scmp.ne.s32.totalorder %s35_s25, %s479_s12  ;;  %p485_p5 = scmp.lt.s32.totalorder %s479_s12, %s479_s12 }
   0xf   :  { %p486_p6 = por %p485_p5, %p484_p4 }
  0x11   :  { %p487_p7 = pnand %p486_p6, %p480_p3 }
  0x13   :  { %490 = shalt.err (!%p487_p7)
}
  0x14   :  { %s657_s13 = smov 64   ;;  %s658_s14 = smov 4  }
  0x15   :  { %40 = dma.hbm_to_vmem [thread:$0]  %s825_s1, 128, %s35_s25, [#allocation6], %s657_s13, %s657_s13, %s658_s14  }
  0x16   :  { %s491_s19 = scalar_lea.hbm %s827_s3, 64 }
  0x17   :  { %p492_p8 = scmp.ne.s32.totalorder %s827_s3, %s491_s19  ;;  %p495_p9 = scmp.lt.u32.totalorder %s491_s19, %s827_s3 }
  0x19   :  { %p497_p10 = pnand %p495_p9, %p492_p8 }
  0x1b   :  { %500 = shalt.err (!%p497_p10)
}
  0x1c   :  { %s501_s24 = scalar_lea.vmem %s60_s27, 64  ;;  %p506_p12 = scmp.lt.s32.totalorder %s60_s27, %s60_s27 }
  0x1d   :  { %p502_p11 = scmp.ne.s32.totalorder %s60_s27, %s501_s24  ;;  %p507_p13 = scmp.lt.s32.totalorder %s501_s24, %s501_s24 }
  0x1f   :  { %p508_p0 = por %p507_p13, %p506_p12 }
  0x21   :  { %p509_p1 = pnand %p508_p0, %p502_p11 }
  0x23   :  { %512 = shalt.err (!%p509_p1)
}
  0x24   :  { %62 = dma.hbm_to_vmem [thread:$0]  %s827_s3, 64, %s60_s27, [#allocation9]  }
  0x25   :  { %s659_s26 = smov [#allocation11]   ;;  %s660_s29 = smov [#allocation2]  }
  0x26   :  { %s78_s28 = sshll.u32 %s659_s26, 4  ;;  %s22_s30 = sshll.u32 %s660_s29, 4  ;;  %s79_s28 = int_to_ptr.vmem [resolvable:$true] %s78_s28  ;;  %s736_s30 = int_to_ptr.vmem [resolvable:$true] %s22_s30 }
  0x27   :  { %s513_s10 = scalar_lea.hbm %s829_s5, 1024 }
  0x28   :  { %p514_p2 = scmp.ne.s32.totalorder %s829_s5, %s513_s10  ;;  %p517_p3 = scmp.lt.u32.totalorder %s513_s10, %s829_s5 }
  0x2a   :  { %p519_p4 = pnand %p517_p3, %p514_p2 }
  0x2c   :  { %522 = shalt.err (!%p519_p4)
}
  0x2d   :  { %s523_s3 = scalar_lea.vmem %s79_s28, 1024  ;;  %p528_p6 = scmp.lt.s32.totalorder %s79_s28, %s79_s28 }
  0x2e   :  { %p524_p5 = scmp.ne.s32.totalorder %s79_s28, %s523_s3  ;;  %p529_p7 = scmp.lt.s32.totalorder %s523_s3, %s523_s3 }
  0x30   :  { %p530_p8 = por %p529_p7, %p528_p6 }
  0x32   :  { %p531_p9 = pnand %p530_p8, %p524_p5 }
  0x34   :  { %534 = shalt.err (!%p531_p9)
}
  0x35   :  { %84 = dma.hbm_to_vmem [thread:$0]  %s829_s5, 1024, %s79_s28, [#allocation12], %s657_s13, %s657_s13, %s658_s14  }
  0x36   :  { %s535_s20 = scalar_lea.hbm %s824_s0, 128 }
  0x37   :  { %p536_p10 = scmp.ne.s32.totalorder %s824_s0, %s535_s20  ;;  %p539_p11 = scmp.lt.u32.totalorder %s535_s20, %s824_s0 }
  0x39   :  { %p541_p12 = pnand %p539_p11, %p536_p10 }
  0x3b   :  { %544 = shalt.err (!%p541_p12)
}
  0x3c   :  { %s545_s1 = scalar_lea.vmem %s736_s30, 128  ;;  %p550_p0 = scmp.lt.s32.totalorder %s736_s30, %s736_s30 }
  0x3d   :  { %p546_p13 = scmp.ne.s32.totalorder %s736_s30, %s545_s1  ;;  %p551_p1 = scmp.lt.s32.totalorder %s545_s1, %s545_s1 }
  0x3f   :  { %p552_p2 = por %p551_p1, %p550_p0 }
  0x41   :  { %p553_p3 = pnand %p552_p2, %p546_p13 }
  0x43   :  { %556 = shalt.err (!%p553_p3)
}
  0x44   :  { %28 = dma.hbm_to_vmem [thread:$0]  %s824_s0, 128, %s736_s30, [#allocation3], %s657_s13, %s657_s13, %s658_s14  }
  0x45   :  { %s661_s26 = smov [#allocation7]   ;;  %s662_s29 = smov [#allocation10]  }
  0x46   :  { %s46_s28 = sshll.u32 %s661_s26, 4  ;;  %s69_s8 = sshll.u32 %s662_s29, 4  ;;  %s47_s28 = int_to_ptr.vmem [resolvable:$true] %s46_s28  ;;  %s70_s8 = int_to_ptr.vmem [resolvable:$true] %s69_s8 }
  0x47   :  { %s557_s11 = scalar_lea.hbm %s826_s2, 128 }
  0x48   :  { %p558_p4 = scmp.ne.s32.totalorder %s826_s2, %s557_s11  ;;  %p561_p5 = scmp.lt.u32.totalorder %s557_s11, %s826_s2 }
  0x4a   :  { %p563_p6 = pnand %p561_p5, %p558_p4 }
  0x4c   :  { %566 = shalt.err (!%p563_p6)
}
  0x4d   :  { %s567_s0 = scalar_lea.vmem %s47_s28, 128  ;;  %p572_p8 = scmp.lt.s32.totalorder %s47_s28, %s47_s28 }
  0x4e   :  { %p568_p7 = scmp.ne.s32.totalorder %s47_s28, %s567_s0  ;;  %p573_p9 = scmp.lt.s32.totalorder %s567_s0, %s567_s0 }
  0x50   :  { %p574_p10 = por %p573_p9, %p572_p8 }
  0x52   :  { %p575_p11 = pnand %p574_p10, %p568_p7 }
  0x54   :  { %578 = shalt.err (!%p575_p11)
}
  0x55   :  { %52 = dma.hbm_to_vmem [thread:$0]  %s826_s2, 128, %s47_s28, [#allocation6], %s657_s13, %s657_s13, %s658_s14  }
  0x56   :  { %s579_s19 = scalar_lea.hbm %s828_s4, 16 }
  0x57   :  { %p580_p12 = scmp.ne.s32.totalorder %s828_s4, %s579_s19  ;;  %p583_p13 = scmp.lt.u32.totalorder %s579_s19, %s828_s4 }
  0x59   :  { %p585_p0 = pnand %p583_p13, %p580_p12 }
  0x5b   :  { %588 = shalt.err (!%p585_p0)
}
  0x5c   :  { %s589_s24 = scalar_lea.vmem %s70_s8, 16  ;;  %s593_s1 = scalar_lea.vmem %s70_s8, 32 }
  0x5d   :  { %p590_p1 = scmp.ne.s32.totalorder %s70_s8, %s589_s24  ;;  %p594_p2 = scmp.lt.s32.totalorder %s70_s8, %s70_s8 }
  0x5e   :  { %p595_p3 = scmp.lt.s32.totalorder %s593_s1, %s589_s24 }
  0x60   :  { %p596_p4 = por %p595_p3, %p594_p2 }
  0x62   :  { %p597_p5 = pnand %p596_p4, %p590_p1 }
  0x64   :  { %600 = shalt.err (!%p597_p5)
}
  0x65   :  { %72 = dma.hbm_to_vmem [thread:$0]  %s828_s4, 16, %s70_s8, [#allocation9]  }
  0x66   :  { %s663_s14 = smov [#allocation13]   ;;  %s601_s28 = scalar_lea.hbm %s830_s6, 16 }
  0x67   :  { %s91_s5 = sshll.u32 %s663_s14, 4  ;;  %p602_p6 = scmp.ne.s32.totalorder %s830_s6, %s601_s28  ;;  %s92_s5 = int_to_ptr.vmem [resolvable:$true] %s91_s5 }
  0x68   :  { %p605_p7 = scmp.lt.u32.totalorder %s601_s28, %s830_s6 }
  0x6a   :  { %p607_p8 = pnand %p605_p7, %p602_p6 }
  0x6c   :  { %610 = shalt.err (!%p607_p8)
}
  0x6d   :  { %s611_s12 = scalar_lea.vmem %s92_s5, 16  ;;  %s615_s4 = scalar_lea.vmem %s92_s5, 32 }
  0x6e   :  { %p612_p9 = scmp.ne.s32.totalorder %s92_s5, %s611_s12  ;;  %p616_p10 = scmp.lt.s32.totalorder %s92_s5, %s92_s5 }
  0x6f   :  { %p617_p11 = scmp.lt.s32.totalorder %s615_s4, %s611_s12 }
  0x71   :  { %p618_p12 = por %p617_p11, %p616_p10 }
  0x73   :  { %p619_p13 = pnand %p618_p12, %p612_p9 }
  0x75   :  { %622 = shalt.err (!%p619_p13)
}
  0x76   :  { %94 = dma.hbm_to_vmem [thread:$0]  %s830_s6, 16, %s92_s5, [#allocation12]  }
  0x77   :  { %645 = dma.done.wait [#allocation3], 128  }
  0x78   :  { %646 = vsyncadd [#allocation3], 4294967168 }
  0x79   :  { %647 = dma.done.wait [#allocation6], 256  }
  0x7a   :  { %648 = vsyncadd [#allocation6], 4294967040 }
  0x7b   :  { %649 = dma.done.wait [#allocation9], 80  }
  0x7c   :  { %650 = vsyncadd [#allocation9], 4294967216 }
  0x7d   :  { %651 = dma.done.wait [#allocation12], 1040  }
  0x7e   :  { %652 = vsyncadd [#allocation12], 4294966256  ;;  %v664_v0 = vmov 0.0   ;;  %vm665_vm0 = vmmov 0   ;;  %vm133_vm1 = vcmask 1043456   ;;  %v458_v3 = vld [vmem:[#allocation5] sm:$0xff]  }
  0x7f   :  { %412 = vmatprep.subr.bf16.mxu1 %v664_v0  ;;  %414 = vmatprep.mubr.msk.bf16.mxu1 %vm665_vm0, %v664_v0  ;;  %v123_v1 = vld [vmem:[#allocation8] sm:$0xf]  ;;  %vm129_vm2 = vcmask 64512   ;;  %v459_v4 = vld [vmem:[#allocation7] sm:$0xff]   ;;  %v461_v5 = vld [vmem:[#allocation11] sm:$0xff]   ;;  %vm189_vm3 = vcmask 130048  }
  0x80   :  { %424 = vmatprep.subr.bf16.mxu0 %v664_v0  ;;  %440 = vmatprep.mubr.msk.bf16.mxu0 %vm665_vm0, %v664_v0  ;;  %v135_v2 = vsel %vm133_vm1, %v123_v1, 0  ;;  %v462_v6 = vld [vmem:[#allocation11 + $0x8] sm:$0xff]   ;;  %v463_v8 = vld [vmem:[#allocation11 + $0x10] sm:$0xff]   ;;  %v464_v9 = vld [vmem:[#allocation11 + $0x18] sm:$0xff]   ;;  %s666_s6 = smov [#allocation14]  }
  0x81   :  { %413 = vmatpush3.bf16.msra.mxu1 %v135_v2  ;;  %425 = vmatpush3.bf16.msra.mxu0 %v461_v5  ;;  %v460_v7 = vld [vmem:[#allocation2] sm:$0xff]   ;;  %v467_v12 = vld [vmem:[#allocation11 + $0x30] sm:$0xff]   ;;  %v468_v13 = vld [vmem:[#allocation11 + $0x38] sm:$0xff]   ;;  %s369_s16 = sshll.u32 %s666_s6, 4  ;;  %s370_s16 = int_to_ptr.vmem [resolvable:$true] %s369_s16 }
  0x82   :  { %418 = vmatprep.subr.bf16.mxu1 %v664_v0  ;;  %426 = vmatprep.subr.bf16.mxu0 %v664_v0  ;;  %v465_v10 = vld [vmem:[#allocation11 + $0x20] sm:$0xff]   ;;  %v466_v11 = vld [vmem:[#allocation11 + $0x28] sm:$0xff]   ;;  %v389_v19 = vld [vmem:[#allocation10] ss:$0 sm:$0xff]  ;;  %s623_s3 = scalar_lea.vmem %s370_s16, 256  ;;  %p628_p1 = scmp.lt.s32.totalorder %s370_s16, %s370_s16 }
  0x83   :  { %v390_v32 = vld [vmem:[#allocation13] ss:$0 sm:$0xff]  ;;  %p624_p0 = scmp.ne.s32.totalorder %s370_s16, %s623_s3  ;;  %p629_p2 = scmp.lt.s32.totalorder %s623_s3, %s623_s3 }
  0x84   :  { %415 = vmatmul.mubr.msk.bf16.vlgmr.msra.gmra.mrb[0].mxu1 %vm129_vm2, %v458_v3 }
  0x85   :  { %419 = vmatpush3.bf16.msra.mxu1 %v459_v4  ;;  %420 = vmatprep.mubr.msk.bf16.mxu1 %vm665_vm0, %v664_v0  ;;  %p630_p3 = por %p629_p2, %p628_p1 }
  0x86   :  { %427 = vmatpush3.bf16.msra.mxu0 %v462_v6 }
  0x87   :  { %428 = vmatprep.subr.bf16.mxu0 %v664_v0  ;;  %p631_p4 = pnand %p630_p3, %p624_p0 }
  0x8a   :  { %429 = vmatpush3.bf16.msra.mxu0 %v463_v8 }
  0x8b   :  { %430 = vmatprep.subr.bf16.mxu0 %v664_v0 }
  0x8c   :  { %421 = vmatmul.mubr.msk.bf16.vlgmr.msra.gmra.mrb[4].mxu1 %vm189_vm3, %v460_v7 }
  0x8e   :  { %431 = vmatpush3.bf16.msra.mxu0 %v464_v9 }
  0x8f   :  { %432 = vmatprep.subr.bf16.mxu0 %v664_v0 }
  0x92   :  { %433 = vmatpush3.bf16.msra.mxu0 %v465_v10 }
  0x93   :  { %434 = vmatprep.subr.bf16.mxu0 %v664_v0 }
  0x96   :  { %435 = vmatpush3.bf16.msra.mxu0 %v466_v11 }
  0x97   :  { %436 = vmatprep.subr.bf16.mxu0 %v664_v0 }
  0x9a   :  { %437 = vmatpush3.bf16.msra.mxu0 %v467_v12 }
  0x9b   :  { %438 = vmatprep.subr.bf16.mxu0 %v664_v0 }
  0x9e   :  { %439 = vmatpush3.bf16.msra.mxu0 %v468_v13 }
 0x157   :  { %v171_v14 = vpop.f32.mrb[0].mxu1 }
 0x158   :  { %v416_v15 = vpop.f32.mrb[1].mxu1 }
 0x159   :  { %v174_v16 = vpop.f32.mrb[2].mxu1 }
 0x15a   :  { %v417_v17 = vpop.f32.mrb[3].mxu1 }
 0x15f   :  { %v227_v18 = vpop.f32.mrb[4].mxu1 }
 0x160   :  { %v228_v20 = vadd.f32 %v227_v18, %v171_v14  ;;  %v422_v21 = vpop.f32.mrb[5].mxu1 }
 0x161   :  { %v230_v22 = vpop.f32.mrb[6].mxu1 }
 0x162   :  { %v241_v23 = vadd.f32 %v389_v19, %v228_v20  ;;  %v231_v24 = vadd.f32 %v230_v22, %v174_v16  ;;  %v423_v25 = vpop.f32.mrb[7].mxu1 }
 0x164   :  { %v245_v26 = vmul.f32 0.01, %v241_v23  ;;  %v242_v27 = vadd.f32 %v389_v19, %v231_v24  ;;  %vm243_vm4 = vcmp.ge.f32.partialorder %v241_v23, 0.0 }
 0x166   :  { %vm244_vm5 = vcmp.ge.f32.partialorder %v242_v27, 0.0  ;;  %v246_v28 = vmul.f32 0.01, %v242_v27  ;;  %v247_v29 = vsel %vm243_vm4, %v241_v23, %v245_v26 }
 0x168   :  { %v248_v30 = vsel %vm244_vm5, %v242_v27, %v246_v28 }
 0x169   :  { %v249_v31 = vpack.c.bf16 %v248_v30, %v247_v29 }
 0x16b   :  { %441 = vmatmul.mubr.bf16.vlgmr.msra.gmra.mrb[0].mxu0 %v249_v31 }
 0x23e   :  { %v355_v33 = vpop.f32.mrb[0].mxu0 }
 0x23f   :  { %v356_v34 = vadd.f32 %v390_v32, %v355_v33  ;;  %v442_v35 = vpop.f32.mrb[1].mxu0 }
 0x240   :  { %v358_v36 = vpop.f32.mrb[2].mxu0 }
 0x241   :  { %362 = vst [vmem:[#allocation14] sm:$0xff] %v356_v34  ;;  %v359_v37 = vadd.f32 %v390_v32, %v358_v36  ;;  %v443_v38 = vpop.f32.mrb[3].mxu0 }
 0x243   :  { %363 = vst [vmem:[#allocation14 + $0x8] sm:$0xff] %v359_v37 }
 0x244   :  { %634 = shalt.err (!%p631_p4)
}
 0x245   :  { %s635_s27 = scalar_lea.hbm %s831_s7, 256 }
 0x246   :  { %p636_p5 = scmp.ne.s32.totalorder %s831_s7, %s635_s27  ;;  %p639_p6 = scmp.lt.u32.totalorder %s635_s27, %s831_s7 }
 0x248   :  { %p641_p7 = pnand %p639_p6, %p636_p5 }
 0x24a   :  { %644 = shalt.err (!%p641_p7)
}
 0x24b   :  { %s667_s21 = smov 128   ;;  %s668_s22 = smov 8  }
 0x24c   :  { %375 = dma.vmem_to_hbm [thread:$0]  %s370_s16, 256, %s831_s7, [#allocation4], %s667_s21, %s667_s21, %s668_s22  }
 0x24d   :  { %653 = dma.done.wait [#allocation4], 256  }
 0x24e   :  { %654 = vsyncadd [#allocation4], 4294967040 }
 0x24f   :  { %379 = vsyncpa [#allocation3], 1 }
 0x250   :  { %380 = vsyncpa [#allocation6], 1 }
 0x251   :  { %381 = vsyncpa [#allocation9], 1 }
 0x252   :  { %382 = vsyncpa [#allocation12], 1 }
 0x253   :  { %383 = vsyncpa [#allocation4], 1 }

</bundles_post_ra>
